<compile_context>
chip_gen: v5e
topology: v5e:2x2
jax: 0.10.0
libtpu: 0.0.40
codegen_flags: <defaults>
</compile_context>

<pallas_src>
import math
import jax
import jax.numpy as jnp
from jax.experimental import pallas as pl
from jax.experimental.pallas import tpu as pltpu

N_CHANNELS = 252
N_CLASSES = 11
HIDDEN = [512, 256, 128, 64]
BN_EPS = 1e-5

OUT_PAD = 128        # classifier output lanes padded 11 -> 128 (lane-dense)
TILE_N_MAX = 2048    # rows per grid step
MIN_GRID_STEPS = 4   # keep >= 4 grid steps so v7x's 2 TCs both get work


def _round_up(a, b):
    return ((a + b - 1) // b) * b


def _cdiv(a, b):
    return -(-a // b)


def _mlp_kernel(x_ref,
                w1_ref, b1_ref,
                w2_ref, b2_ref,
                w3_ref, b3_ref,
                w4_ref, b4_ref,
                w5_ref, b5_ref,
                o_ref):
    """One batch tile of the SIGNNet MLP. Weights are bf16 and VMEM-resident."""
    # x tile arrives as raw f32 straight from HBM; cast to bf16 for the MXU.
    # f32 accumulation everywhere; bias-add / ReLU in f32 on the VPU.
    h = x_ref[...].astype(jnp.bfloat16)

    h = jnp.dot(h, w1_ref[...], preferred_element_type=jnp.float32) + b1_ref[...]
    h = jnp.maximum(h, 0.0)

    h = jnp.dot(h.astype(jnp.bfloat16), w2_ref[...],
                preferred_element_type=jnp.float32) + b2_ref[...]
    h = jnp.maximum(h, 0.0)

    h = jnp.dot(h.astype(jnp.bfloat16), w3_ref[...],
                preferred_element_type=jnp.float32) + b3_ref[...]
    h = jnp.maximum(h, 0.0)

    h = jnp.dot(h.astype(jnp.bfloat16), w4_ref[...],
                preferred_element_type=jnp.float32) + b4_ref[...]
    h = jnp.maximum(h, 0.0)

    # Final classifier layer (no BN / ReLU); output lanes padded to 128, bf16.
    o_ref[...] = (jnp.dot(h.astype(jnp.bfloat16), w5_ref[...],
                          preferred_element_type=jnp.float32)
                  + b5_ref[...]).astype(o_ref.dtype)


def signnet_forward(x, kernel_params):
    """x: (N, 252) float array. kernel_params: 5 (W bf16 (in,out), b f32 (1,out))."""
    n = x.shape[0]
    x = x.astype(jnp.float32)

    # Row tile: large for throughput, multiple of 16, capped so the grid has
    # at least MIN_GRID_STEPS steps (v7x dual-TC sharding of the batch axis).
    tile_n = min(TILE_N_MAX, max(16, _round_up(_cdiv(n, MIN_GRID_STEPS), 16)))
    grid_n = _cdiv(n, tile_n)
    n_pad = grid_n * tile_n
    # Row padding only when needed (no-op for batch sizes that are multiples
    # of tile_n); no column pad, no dtype cast in the wrapper.
    x_in = x if n_pad == n else jnp.pad(x, ((0, n_pad - n), (0, 0)))

    flat = [x_in]
    weight_specs = []
    for w, b in kernel_params:
        flat.append(w)
        flat.append(b)
        # Full-array blocks with constant index_map -> fetched once, VMEM resident.
        weight_specs.append(pl.BlockSpec(w.shape, lambda i: (0, 0)))
        weight_specs.append(pl.BlockSpec(b.shape, lambda i: (0, 0)))

    flops_per_row = 2 * (N_CHANNELS * 512 + 512 * 256 + 256 * 128
                         + 128 * 64 + 64 * OUT_PAD)
    weight_bytes = sum(w.size * w.dtype.itemsize + b.size * b.dtype.itemsize
                       for w, b in kernel_params)
    bytes_accessed = n_pad * (N_CHANNELS * 4 + OUT_PAD * 2) + weight_bytes

    out = pl.pallas_call(
        _mlp_kernel,
        out_shape=jax.ShapeDtypeStruct((n_pad, OUT_PAD), jnp.bfloat16),
        grid_spec=pltpu.PrefetchScalarGridSpec(
            num_scalar_prefetch=0,
            grid=(grid_n,),
            in_specs=[pl.BlockSpec((tile_n, N_CHANNELS), lambda i: (i, 0))]
                     + weight_specs,
            out_specs=pl.BlockSpec((tile_n, OUT_PAD), lambda i: (i, 0)),
        ),
        compiler_params=pltpu.CompilerParams(
            dimension_semantics=("parallel",),
            vmem_limit_bytes=32 * 1024 * 1024),
        cost_estimate=pl.CostEstimate(
            flops=n_pad * flops_per_row,
            transcendentals=0,
            bytes_accessed=bytes_accessed),
    )(*flat)

    # bf16 logits; slice away batch/row and lane padding.
    return out[:n, :N_CLASSES]


def _xavier_uniform_relu(key, fan_out, fan_in):
    """torch.nn.init.xavier_uniform_ with gain = calculate_gain('relu') = sqrt(2).
    Returns weight in PyTorch layout (out, in)."""
    gain = math.sqrt(2.0)
    bound = gain * math.sqrt(6.0 / (fan_in + fan_out))
    return jax.random.uniform(key, (fan_out, fan_in), jnp.float32,
                              minval=-bound, maxval=bound)


def build_params(key):
    """Deterministic parameters mirroring SIGNNet.__init__, eval-mode BN folded,
    laid out for the kernel: W as (in, out_padded) bf16, b as (1, out_padded) f32.
    Only the classifier's output dim is padded (11 -> 128)."""
    dims = [N_CHANNELS] + HIDDEN + [N_CLASSES]
    keys = jax.random.split(key, len(dims) - 1)
    params = []
    for li in range(len(dims) - 1):
        fan_in, fan_out = dims[li], dims[li + 1]
        w = _xavier_uniform_relu(keys[li], fan_out, fan_in)   # (out, in) f32
        b = jnp.full((fan_out,), 0.1, jnp.float32)            # constant 0.1

        # Fold eval-mode BatchNorm1d (gamma=1, beta=0, mean=0, var=1, eps=1e-5)
        # into the linear for the first four layers.
        if li < len(dims) - 2:
            scale = 1.0 / jnp.sqrt(1.0 + BN_EPS)              # gamma/sqrt(var+eps)
            w = w * scale
            b = b * scale                                     # beta - mean*scale = 0

        wt = jnp.asarray(w.T)                                 # (in, out)
        brow = b.reshape(1, fan_out)

        # Lane padding for the classifier output: 11 -> 128.
        if li == len(dims) - 2:
            wt = jnp.zeros((fan_in, OUT_PAD), jnp.float32).at[:, :fan_out].set(wt)
            brow = jnp.zeros((1, OUT_PAD), jnp.float32).at[:, :fan_out].set(brow)

        params.append((wt.astype(jnp.bfloat16), brow.astype(jnp.float32)))
    return params


def signnet_reference(x, kernel_params):
    """Plain-JAX reference emulating the kernel math (bf16 matmul inputs,
    f32 accumulation / bias / ReLU, bf16 output) on the same parameters."""
    h = x.astype(jnp.float32)
    for i, (w, b) in enumerate(kernel_params):
        h = jnp.dot(h.astype(jnp.bfloat16), w,
                    preferred_element_type=jnp.float32) + b
        if i < len(kernel_params) - 1:
            h = jnp.maximum(h, 0.0)
    return h.astype(jnp.bfloat16)[:, :N_CLASSES]


if __name__ == "__main__":
    key = jax.random.PRNGKey(0)
    k_param, k_x = jax.random.split(key)

    params = build_params(k_param)
    batch = 8
    x = jax.random.normal(k_x, (batch, N_CHANNELS), jnp.float32)

    out = signnet_forward(x, params)
    out = jax.block_until_ready(out)

    ref = signnet_reference(x, params)
    assert out.shape == (batch, N_CLASSES), out.shape
    assert jnp.allclose(out.astype(jnp.float32), ref.astype(jnp.float32),
                        atol=5e-2, rtol=5e-2), "mismatch vs reference"

    print("KERNEL_OK")
</pallas_src>

<mosaic_0001>
module attributes {stable_mosaic.version = 11 : i64} {
  func.func @_mlp_kernel(%arg0: i32, %arg1: memref<16x252xf32, #tpu.memory_space<vmem>>, %arg2: memref<252x512xbf16, #tpu.memory_space<vmem>>, %arg3: memref<1x512xf32, #tpu.memory_space<vmem>>, %arg4: memref<512x256xbf16, #tpu.memory_space<vmem>>, %arg5: memref<1x256xf32, #tpu.memory_space<vmem>>, %arg6: memref<256x128xbf16, #tpu.memory_space<vmem>>, %arg7: memref<1x128xf32, #tpu.memory_space<vmem>>, %arg8: memref<128x64xbf16, #tpu.memory_space<vmem>>, %arg9: memref<1x64xf32, #tpu.memory_space<vmem>>, %arg10: memref<64x128xbf16, #tpu.memory_space<vmem>>, %arg11: memref<1x128xf32, #tpu.memory_space<vmem>>, %arg12: memref<16x128xbf16, #tpu.memory_space<vmem>>) attributes {dimension_semantics = [#tpu.dimension_semantics<parallel>], iteration_bounds = array<i64: 1>, scalar_prefetch = 0 : i64, scratch_operands = 0 : i64, tpu.core_type = #tpu.core_type<tc>, window_params = [{transform_indices = @transform_0, window_bounds = array<i64: 16, 252>}, {pipeline_mode = #tpu.pipeline_mode<synchronous>, transform_indices = @transform_1, window_bounds = array<i64: 252, 512>}, {pipeline_mode = #tpu.pipeline_mode<synchronous>, transform_indices = @transform_2, window_bounds = array<i64: 1, 512>}, {pipeline_mode = #tpu.pipeline_mode<synchronous>, transform_indices = @transform_3, window_bounds = array<i64: 512, 256>}, {pipeline_mode = #tpu.pipeline_mode<synchronous>, transform_indices = @transform_4, window_bounds = array<i64: 1, 256>}, {pipeline_mode = #tpu.pipeline_mode<synchronous>, transform_indices = @transform_5, window_bounds = array<i64: 256, 128>}, {pipeline_mode = #tpu.pipeline_mode<synchronous>, transform_indices = @transform_6, window_bounds = array<i64: 1, 128>}, {pipeline_mode = #tpu.pipeline_mode<synchronous>, transform_indices = @transform_7, window_bounds = array<i64: 128, 64>}, {pipeline_mode = #tpu.pipeline_mode<synchronous>, transform_indices = @transform_8, window_bounds = array<i64: 1, 64>}, {pipeline_mode = #tpu.pipeline_mode<synchronous>, transform_indices = @transform_9, window_bounds = array<i64: 64, 128>}, {pipeline_mode = #tpu.pipeline_mode<synchronous>, transform_indices = @transform_10, window_bounds = array<i64: 1, 128>}, {transform_indices = @transform_11, window_bounds = array<i64: 16, 128>}]} {
    %c0 = arith.constant 0 : index
    %c0_0 = arith.constant 0 : index
    %0 = vector.load %arg1[%c0, %c0_0] : memref<16x252xf32, #tpu.memory_space<vmem>>, vector<16x252xf32>
    %1 = arith.truncf %0 : vector<16x252xf32> to vector<16x252xbf16>
    %c0_1 = arith.constant 0 : index
    %c0_2 = arith.constant 0 : index
    %2 = vector.load %arg2[%c0_1, %c0_2] : memref<252x512xbf16, #tpu.memory_space<vmem>>, vector<252x512xbf16>
    %cst = arith.constant dense<0.000000e+00> : vector<16x512xf32>
    %3 = tpu.matmul %1, %2, %cst {dimension_numbers = #tpu.dot_dimension_numbers<[1], [0], [0], [1], [0, 0, 1, 1], [], []>} : vector<16x252xbf16>, vector<252x512xbf16>, vector<16x512xf32> -> vector<16x512xf32>
    %c0_3 = arith.constant 0 : index
    %c0_4 = arith.constant 0 : index
    %4 = vector.load %arg3[%c0_3, %c0_4] : memref<1x512xf32, #tpu.memory_space<vmem>>, vector<1x512xf32>
    %5 = vector.broadcast %4 : vector<1x512xf32> to vector<16x512xf32>
    %6 = arith.addf %3, %5 : vector<16x512xf32>
    %cst_5 = arith.constant 0.000000e+00 : f32
    %7 = vector.broadcast %cst_5 : f32 to vector<16x512xf32>
    %8 = arith.maximumf %6, %7 : vector<16x512xf32>
    %9 = arith.truncf %8 : vector<16x512xf32> to vector<16x512xbf16>
    %c0_6 = arith.constant 0 : index
    %c0_7 = arith.constant 0 : index
    %10 = vector.load %arg4[%c0_6, %c0_7] : memref<512x256xbf16, #tpu.memory_space<vmem>>, vector<512x256xbf16>
    %cst_8 = arith.constant dense<0.000000e+00> : vector<16x256xf32>
    %11 = tpu.matmul %9, %10, %cst_8 {dimension_numbers = #tpu.dot_dimension_numbers<[1], [0], [0], [1], [0, 0, 1, 1], [], []>} : vector<16x512xbf16>, vector<512x256xbf16>, vector<16x256xf32> -> vector<16x256xf32>
    %c0_9 = arith.constant 0 : index
    %c0_10 = arith.constant 0 : index
    %12 = vector.load %arg5[%c0_9, %c0_10] : memref<1x256xf32, #tpu.memory_space<vmem>>, vector<1x256xf32>
    %13 = vector.broadcast %12 : vector<1x256xf32> to vector<16x256xf32>
    %14 = arith.addf %11, %13 : vector<16x256xf32>
    %cst_11 = arith.constant 0.000000e+00 : f32
    %15 = vector.broadcast %cst_11 : f32 to vector<16x256xf32>
    %16 = arith.maximumf %14, %15 : vector<16x256xf32>
    %17 = arith.truncf %16 : vector<16x256xf32> to vector<16x256xbf16>
    %c0_12 = arith.constant 0 : index
    %c0_13 = arith.constant 0 : index
    %18 = vector.load %arg6[%c0_12, %c0_13] : memref<256x128xbf16, #tpu.memory_space<vmem>>, vector<256x128xbf16>
    %cst_14 = arith.constant dense<0.000000e+00> : vector<16x128xf32>
    %19 = tpu.matmul %17, %18, %cst_14 {dimension_numbers = #tpu.dot_dimension_numbers<[1], [0], [0], [1], [0, 0, 1, 1], [], []>} : vector<16x256xbf16>, vector<256x128xbf16>, vector<16x128xf32> -> vector<16x128xf32>
    %c0_15 = arith.constant 0 : index
    %c0_16 = arith.constant 0 : index
    %20 = vector.load %arg7[%c0_15, %c0_16] : memref<1x128xf32, #tpu.memory_space<vmem>>, vector<1x128xf32>
    %21 = vector.broadcast %20 : vector<1x128xf32> to vector<16x128xf32>
    %22 = arith.addf %19, %21 : vector<16x128xf32>
    %cst_17 = arith.constant 0.000000e+00 : f32
    %23 = vector.broadcast %cst_17 : f32 to vector<16x128xf32>
    %24 = arith.maximumf %22, %23 : vector<16x128xf32>
    %25 = arith.truncf %24 : vector<16x128xf32> to vector<16x128xbf16>
    %c0_18 = arith.constant 0 : index
    %c0_19 = arith.constant 0 : index
    %26 = vector.load %arg8[%c0_18, %c0_19] : memref<128x64xbf16, #tpu.memory_space<vmem>>, vector<128x64xbf16>
    %cst_20 = arith.constant dense<0.000000e+00> : vector<16x64xf32>
    %27 = tpu.matmul %25, %26, %cst_20 {dimension_numbers = #tpu.dot_dimension_numbers<[1], [0], [0], [1], [0, 0, 1, 1], [], []>} : vector<16x128xbf16>, vector<128x64xbf16>, vector<16x64xf32> -> vector<16x64xf32>
    %c0_21 = arith.constant 0 : index
    %c0_22 = arith.constant 0 : index
    %28 = vector.load %arg9[%c0_21, %c0_22] : memref<1x64xf32, #tpu.memory_space<vmem>>, vector<1x64xf32>
    %29 = vector.broadcast %28 : vector<1x64xf32> to vector<16x64xf32>
    %30 = arith.addf %27, %29 : vector<16x64xf32>
    %cst_23 = arith.constant 0.000000e+00 : f32
    %31 = vector.broadcast %cst_23 : f32 to vector<16x64xf32>
    %32 = arith.maximumf %30, %31 : vector<16x64xf32>
    %33 = arith.truncf %32 : vector<16x64xf32> to vector<16x64xbf16>
    %c0_24 = arith.constant 0 : index
    %c0_25 = arith.constant 0 : index
    %34 = vector.load %arg10[%c0_24, %c0_25] : memref<64x128xbf16, #tpu.memory_space<vmem>>, vector<64x128xbf16>
    %cst_26 = arith.constant dense<0.000000e+00> : vector<16x128xf32>
    %35 = tpu.matmul %33, %34, %cst_26 {dimension_numbers = #tpu.dot_dimension_numbers<[1], [0], [0], [1], [0, 0, 1, 1], [], []>} : vector<16x64xbf16>, vector<64x128xbf16>, vector<16x128xf32> -> vector<16x128xf32>
    %c0_27 = arith.constant 0 : index
    %c0_28 = arith.constant 0 : index
    %36 = vector.load %arg11[%c0_27, %c0_28] : memref<1x128xf32, #tpu.memory_space<vmem>>, vector<1x128xf32>
    %37 = vector.broadcast %36 : vector<1x128xf32> to vector<16x128xf32>
    %38 = arith.addf %35, %37 : vector<16x128xf32>
    %39 = arith.truncf %38 : vector<16x128xf32> to vector<16x128xbf16>
    %c0_29 = arith.constant 0 : index
    %c0_30 = arith.constant 0 : index
    %40 = vector.load %arg12[%c0_29, %c0_30] : memref<16x128xbf16, #tpu.memory_space<vmem>>, vector<16x128xbf16>
    tpu.vector_store %arg12[%c0_29, %c0_30], %39 {strides = array<i32>} : memref<16x128xbf16, #tpu.memory_space<vmem>>, vector<16x128xbf16>,
    return
  }
  func.func @transform_0(%arg0: i32) -> (i32, i32) {
    %c0_i32 = arith.constant 0 : i32
    %c0_i32_0 = arith.constant 0 : i32
    return %arg0, %c0_i32 : i32, i32
  }
  func.func @transform_1(%arg0: i32) -> (i32, i32) {
    %c0_i32 = arith.constant 0 : i32
    %c0_i32_0 = arith.constant 0 : i32
    %c0_i32_1 = arith.constant 0 : i32
    return %c0_i32, %c0_i32_0 : i32, i32
  }
  func.func @transform_2(%arg0: i32) -> (i32, i32) {
    %c0_i32 = arith.constant 0 : i32
    %c0_i32_0 = arith.constant 0 : i32
    %c0_i32_1 = arith.constant 0 : i32
    return %c0_i32, %c0_i32_0 : i32, i32
  }
  func.func @transform_3(%arg0: i32) -> (i32, i32) {
    %c0_i32 = arith.constant 0 : i32
    %c0_i32_0 = arith.constant 0 : i32
    %c0_i32_1 = arith.constant 0 : i32
    return %c0_i32, %c0_i32_0 : i32, i32
  }
  func.func @transform_4(%arg0: i32) -> (i32, i32) {
    %c0_i32 = arith.constant 0 : i32
    %c0_i32_0 = arith.constant 0 : i32
    %c0_i32_1 = arith.constant 0 : i32
    return %c0_i32, %c0_i32_0 : i32, i32
  }
  func.func @transform_5(%arg0: i32) -> (i32, i32) {
    %c0_i32 = arith.constant 0 : i32
    %c0_i32_0 = arith.constant 0 : i32
    %c0_i32_1 = arith.constant 0 : i32
    return %c0_i32, %c0_i32_0 : i32, i32
  }
  func.func @transform_6(%arg0: i32) -> (i32, i32) {
    %c0_i32 = arith.constant 0 : i32
    %c0_i32_0 = arith.constant 0 : i32
    %c0_i32_1 = arith.constant 0 : i32
    return %c0_i32, %c0_i32_0 : i32, i32
  }
  func.func @transform_7(%arg0: i32) -> (i32, i32) {
    %c0_i32 = arith.constant 0 : i32
    %c0_i32_0 = arith.constant 0 : i32
    %c0_i32_1 = arith.constant 0 : i32
    return %c0_i32, %c0_i32_0 : i32, i32
  }
  func.func @transform_8(%arg0: i32) -> (i32, i32) {
    %c0_i32 = arith.constant 0 : i32
    %c0_i32_0 = arith.constant 0 : i32
    %c0_i32_1 = arith.constant 0 : i32
    return %c0_i32, %c0_i32_0 : i32, i32
  }
  func.func @transform_9(%arg0: i32) -> (i32, i32) {
    %c0_i32 = arith.constant 0 : i32
    %c0_i32_0 = arith.constant 0 : i32
    %c0_i32_1 = arith.constant 0 : i32
    return %c0_i32, %c0_i32_0 : i32, i32
  }
  func.func @transform_10(%arg0: i32) -> (i32, i32) {
    %c0_i32 = arith.constant 0 : i32
    %c0_i32_0 = arith.constant 0 : i32
    %c0_i32_1 = arith.constant 0 : i32
    return %c0_i32, %c0_i32_0 : i32, i32
  }
  func.func @transform_11(%arg0: i32) -> (i32, i32) {
    %c0_i32 = arith.constant 0 : i32
    %c0_i32_0 = arith.constant 0 : i32
    return %arg0, %c0_i32 : i32, i32
  }
}

</mosaic_0001>

<bundles_post_ra>
// kernel: tpu_custom_call.1
= control target key start
LH: loop header
LB: loop body
LE: loop exit
PB: predicated region body
PF: predicated region fallthrough
CT: control target
= control target key end

     0   :  { %16 = vsyncpa [#allocation3], 0  ;;  %s2540_s0 = inlined_call_operand.vmem [shape: f32[16,252], index: 0, kind: input, shape index: {}]   ;;  %s2541_s1 = inlined_call_operand.hbm [shape: bf16[252,512], index: 1, kind: input, shape index: {}]   ;;  %s2542_s2 = inlined_call_operand.vmem [shape: f32[1,512], index: 2, kind: input, shape index: {}]   ;;  %s2543_s3 = inlined_call_operand.hbm [shape: bf16[512,256], index: 3, kind: input, shape index: {}]   ;;  %s2544_s4 = inlined_call_operand.vmem [shape: f32[1,256], index: 4, kind: input, shape index: {}]   ;;  %s2545_s5 = inlined_call_operand.hbm [shape: bf16[256,128], index: 5, kind: input, shape index: {}]   ;;  %s2546_s6 = inlined_call_operand.vmem [shape: f32[1,128], index: 6, kind: input, shape index: {}]   ;;  %s2547_s7 = inlined_call_operand.vmem [shape: bf16[128,64], index: 7, kind: input, shape index: {}]   ;;  %s2548_s8 = inlined_call_operand.vmem [shape: f32[1,64], index: 8, kind: input, shape index: {}]   ;;  %s2549_s9 = inlined_call_operand.vmem [shape: bf16[64,128], index: 9, kind: input, shape index: {}]   ;;  %s2550_s10 = inlined_call_operand.vmem [shape: f32[1,128], index: 10, kind: input, shape index: {}]   ;;  %s2551_s11 = inlined_call_operand.hbm [shape: bf16[16,128], index: 11, kind: output, shape index: {}]  }
   0x1   :  { %17 = vsyncpa [#allocation6], 0  ;;  %s40_s19 = sshll.u32 %s2543_s3, 4  ;;  %s41_s19 = int_to_ptr.hbm [resolvable:$true] %s40_s19 }
   0x2   :  { %18 = vsyncpa [#allocation4], 0  ;;  %s2363_s20 = smov [#allocation5]   ;;  %s25_s24 = sshll.u32 %s2541_s1, 4  ;;  %s26_s24 = int_to_ptr.hbm [resolvable:$true] %s25_s24 }
   0x3   :  { %s42_s21 = sshll.u32 %s2363_s20, 4  ;;  %s2364_s25 = smov 128   ;;  %s43_s21 = int_to_ptr.vmem [resolvable:$true] %s42_s21 }
   0x4   :  { %s2365_s26 = smov 8   ;;  %s2366_s27 = smov [#allocation2]  }
   0x5   :  { %48 = dma.hbm_to_vmem [thread:$0]  %s41_s19, 8192, %s43_s21, [#allocation6], %s2364_s25, %s2364_s25, %s2365_s26  }
   0x6   :  { %s27_s28 = sshll.u32 %s2366_s27, 4  ;;  %s2367_s29 = smov 256   ;;  %s28_s28 = int_to_ptr.vmem [resolvable:$true] %s27_s28 }
   0x7   :  { %s2368_s30 = smov 16   ;;  %s55_s13 = sshll.u32 %s2545_s5, 4  ;;  %s56_s13 = int_to_ptr.hbm [resolvable:$true] %s55_s13 }
   0x8   :  { %33 = dma.hbm_to_vmem [thread:$0]  %s26_s24, 8192, %s28_s28, [#allocation3], %s2367_s29, %s2367_s29, %s2368_s30  }
   0x9   :  { %s2369_s14 = smov [#allocation7]   ;;  %s2370_s16 = smov 64  }
   0xa   :  { %s57_s15 = sshll.u32 %s2369_s14, 4  ;;  %s2371_s1 = smov 4   ;;  %s58_s15 = int_to_ptr.vmem [resolvable:$true] %s57_s15 }
   0xb   :  { %63 = dma.hbm_to_vmem [thread:$0]  %s56_s13, 2048, %s58_s15, [#allocation6], %s2370_s16, %s2370_s16, %s2371_s1  }
   0xc   :  { %2357 = dma.done.wait [#allocation3], 8192  }
   0xd   :  { %2358 = vsyncadd [#allocation3], 4294959104 }
   0xe   :  { %2359 = dma.done.wait [#allocation6], 10240  }
   0xf   :  { %2360 = vsyncadd [#allocation6], 4294957056  ;;  %vm487_vm0 = vcmask 1045504   ;;  %v1572_v0 = vld [vmem:[#allocation2 + $0xe0] sm:$0xf]  ;;  %vm483_vm1 = vcmask 1014784  }
  0x10   :  { %v2117_v1 = vld [vmem:[#allocation2 + $0xec] sm:$0xf0]  ;;  %v2115_v2 = vld [vmem:[#allocation2 + $0xe4] sm:$0xf]  ;;  %v1574_v4 = vld [vmem:[#allocation2 + $0xf0] sm:$0xf0] }
  0x11   :  { %v1573_v3 = vor.u32 %v2117_v1, %v1572_v0  ;;  %v1700_v5 = vld [vmem:[#allocation2 + $0x1e0] sm:$0xf]  ;;  %v2149_v6 = vld [vmem:[#allocation2 + $0x1ec] sm:$0x30]  ;;  %v1577_v7 = vor.u32 %v2115_v2, %v1574_v4  ;;  %v2147_v9 = vld [vmem:[#allocation2 + $0x1e4] sm:$0xf] }
  0x12   :  { %v1701_v8 = vor.u32 %v2149_v6, %v1700_v5  ;;  %v1702_v10 = vld [vmem:[#allocation2 + $0x1f0] sm:$0x30]  ;;  %v1556_v11 = vld [vmem:[#allocation2 + $0xc0] sm:$0xf]  ;;  %v2113_v13 = vld [vmem:[#allocation2 + $0xcc] sm:$0xf0] }
  0x13   :  { %500 = vmatpush.bf16.msra.mxu0 %v1573_v3  ;;  %v1705_v12 = vor.u32 %v2147_v9, %v1702_v10  ;;  %v2111_v14 = vld [vmem:[#allocation2 + $0xc4] sm:$0xf]  ;;  %v1558_v15 = vld [vmem:[#allocation2 + $0xd0] sm:$0xf0]  ;;  %528 = vmatpush.bf16.msra.mxu2 %v1577_v7  ;;  %v1557_v17 = vor.u32 %v2113_v13, %v1556_v11  ;;  %v1684_v19 = vld [vmem:[#allocation2 + $0x1c0] sm:$0xf] }
  0x14   :  { %v489_v16 = vsel %vm487_vm0, %v1701_v8, 0  ;;  %v1561_v18 = vor.u32 %v2111_v14, %v1558_v15  ;;  %v2145_v20 = vld [vmem:[#allocation2 + $0x1cc] sm:$0xf0]  ;;  %v2143_v23 = vld [vmem:[#allocation2 + $0x1c4] sm:$0xf]  ;;  %vm1416_vm2 = vcmask 523264  }
  0x15   :  { %514 = vmatpush.bf16.msra.mxu1 %v489_v16  ;;  %v492_v21 = vsel %vm487_vm0, %v1705_v12, 0  ;;  %v1685_v22 = vor.u32 %v2145_v20, %v1684_v19  ;;  %v1686_v24 = vld [vmem:[#allocation2 + $0x1d0] sm:$0xf0]  ;;  %v1540_v26 = vld [vmem:[#allocation2 + $0xa0] sm:$0xf] }
  0x16   :  { %542 = vmatpush.bf16.msra.mxu3 %v492_v21  ;;  %v1689_v25 = vor.u32 %v2143_v23, %v1686_v24  ;;  %v2109_v27 = vld [vmem:[#allocation2 + $0xac] sm:$0xf0]  ;;  %v2107_v28 = vld [vmem:[#allocation2 + $0xa4] sm:$0xf]  ;;  %v1542_v30 = vld [vmem:[#allocation2 + $0xb0] sm:$0xf0] }
  0x17   :  { %501 = vmatpush.bf16.msra.mxu0 %v1557_v17  ;;  %v1541_v29 = vor.u32 %v2109_v27, %v1540_v26  ;;  %v1668_v31 = vld [vmem:[#allocation2 + $0x1a0] sm:$0xf]  ;;  %v2141_v32 = vld [vmem:[#allocation2 + $0x1ac] sm:$0xf0]  ;;  %529 = vmatpush.bf16.msra.mxu2 %v1561_v18  ;;  %v1545_v33 = vor.u32 %v2107_v28, %v1542_v30  ;;  %v2139_v34 = vld [vmem:[#allocation2 + $0x1a4] sm:$0xf] }
  0x18   :  { %v1670_v35 = vld [vmem:[#allocation2 + $0x1b0] sm:$0xf0]  ;;  %v1524_v36 = vld [vmem:[#allocation2 + $0x80] sm:$0xf]  ;;  %v1669_v37 = vor.u32 %v2141_v32, %v1668_v31  ;;  %v2105_v38 = vld [vmem:[#allocation2 + $0x8c] sm:$0xf0] }
  0x19   :  { %515 = vmatpush.bf16.msra.mxu1 %v1685_v22  ;;  %v2103_v39 = vld [vmem:[#allocation2 + $0x84] sm:$0xf]  ;;  %v1526_v40 = vld [vmem:[#allocation2 + $0x90] sm:$0xf0]  ;;  %v1673_v41 = vor.u32 %v2139_v34, %v1670_v35  ;;  %v1652_v42 = vld [vmem:[#allocation2 + $0x180] sm:$0xf]  ;;  %v1525_v44 = vor.u32 %v2105_v38, %v1524_v36 }
  0x1a   :  { %543 = vmatpush.bf16.msra.mxu3 %v1689_v25  ;;  %v2137_v43 = vld [vmem:[#allocation2 + $0x18c] sm:$0xf0]  ;;  %v2135_v45 = vld [vmem:[#allocation2 + $0x184] sm:$0xf]  ;;  %v1654_v46 = vld [vmem:[#allocation2 + $0x190] sm:$0xf0]  ;;  %v1529_v47 = vor.u32 %v2103_v39, %v1526_v40 }
  0x1b   :  { %502 = vmatpush.bf16.msra.mxu0 %v1541_v29  ;;  %530 = vmatpush.bf16.msra.mxu2 %v1545_v33  ;;  %v1508_v48 = vld [vmem:[#allocation2 + $0x60] sm:$0xf]  ;;  %v2101_v49 = vld [vmem:[#allocation2 + $0x6c] sm:$0xf0]  ;;  %v1653_v50 = vor.u32 %v2137_v43, %v1652_v42  ;;  %v2099_v51 = vld [vmem:[#allocation2 + $0x64] sm:$0xf]  ;;  %v1657_v53 = vor.u32 %v2135_v45, %v1654_v46 }
  0x1c   :  { %v1510_v52 = vld [vmem:[#allocation2 + $0x70] sm:$0xf0]  ;;  %v1636_v54 = vld [vmem:[#allocation2 + $0x160] sm:$0xf]  ;;  %v2133_v55 = vld [vmem:[#allocation2 + $0x16c] sm:$0xf0]  ;;  %v1509_v56 = vor.u32 %v2101_v49, %v1508_v48 }
  0x1d   :  { %516 = vmatpush.bf16.msra.mxu1 %v1669_v37  ;;  %v2131_v57 = vld [vmem:[#allocation2 + $0x164] sm:$0xf]  ;;  %v1638_v58 = vld [vmem:[#allocation2 + $0x170] sm:$0xf0]  ;;  %v1513_v59 = vor.u32 %v2099_v51, %v1510_v52  ;;  %v1492_v60 = vld [vmem:[#allocation2 + $0x40] sm:$0xf]  ;;  %v1637_v62 = vor.u32 %v2133_v55, %v1636_v54 }
  0x1e   :  { %544 = vmatpush.bf16.msra.mxu3 %v1673_v41  ;;  %v2097_v61 = vld [vmem:[#allocation2 + $0x4c] sm:$0xf0]  ;;  %v2095_v63 = vld [vmem:[#allocation2 + $0x44] sm:$0xf]  ;;  %v1494_v0 = vld [vmem:[#allocation2 + $0x50] sm:$0xf0]  ;;  %v1641_v1 = vor.u32 %v2131_v57, %v1638_v58 }
  0x1f   :  { %503 = vmatpush.bf16.msra.mxu0 %v1525_v44  ;;  %531 = vmatpush.bf16.msra.mxu2 %v1529_v47  ;;  %v1620_v2 = vld [vmem:[#allocation2 + $0x140] sm:$0xf]  ;;  %v2129_v3 = vld [vmem:[#allocation2 + $0x14c] sm:$0xf0]  ;;  %v1493_v4 = vor.u32 %v2097_v61, %v1492_v60  ;;  %v2127_v5 = vld [vmem:[#allocation2 + $0x144] sm:$0xf]  ;;  %v1497_v8 = vor.u32 %v2095_v63, %v1494_v0 }
  0x20   :  { %v1622_v6 = vld [vmem:[#allocation2 + $0x150] sm:$0xf0]  ;;  %v1476_v7 = vld [vmem:[#allocation2 + $0x20] sm:$0xf]  ;;  %v2093_v9 = vld [vmem:[#allocation2 + $0x2c] sm:$0xf0]  ;;  %v1621_v12 = vor.u32 %v2129_v3, %v1620_v2 }
  0x21   :  { %517 = vmatpush.bf16.msra.mxu1 %v1653_v50  ;;  %v2091_v10 = vld [vmem:[#allocation2 + $0x24] sm:$0xf]  ;;  %v1478_v11 = vld [vmem:[#allocation2 + $0x30] sm:$0xf0]  ;;  %v1604_v13 = vld [vmem:[#allocation2 + $0x120] sm:$0xf]  ;;  %v1625_v16 = vor.u32 %v2127_v5, %v1622_v6  ;;  %v1477_v20 = vor.u32 %v2093_v9, %v1476_v7 }
  0x22   :  { %545 = vmatpush.bf16.msra.mxu3 %v1657_v53  ;;  %v2125_v14 = vld [vmem:[#allocation2 + $0x12c] sm:$0xf0]  ;;  %v2123_v15 = vld [vmem:[#allocation2 + $0x124] sm:$0xf]  ;;  %v1606_v17 = vld [vmem:[#allocation2 + $0x130] sm:$0xf0]  ;;  %v1481_v24 = vor.u32 %v2091_v10, %v1478_v11 }
  0x23   :  { %504 = vmatpush.bf16.msra.mxu0 %v1509_v56  ;;  %532 = vmatpush.bf16.msra.mxu2 %v1513_v59  ;;  %v1460_v18 = vld [vmem:[#allocation2] sm:$0xf]  ;;  %v2089_v19 = vld [vmem:[#allocation2 + $0xc] sm:$0xf0]  ;;  %v2087_v21 = vld [vmem:[#allocation2 + $0x4] sm:$0xf]  ;;  %v1605_v28 = vor.u32 %v2125_v14, %v1604_v13  ;;  %v1609_v32 = vor.u32 %v2123_v15, %v1606_v17 }
  0x24   :  { %v1708_v22 = vld [vmem:[#allocation2 + $0x1e8] sm:$0xf]  ;;  %v2150_v23 = vld [vmem:[#allocation2 + $0x1f4] sm:$0x30]  ;;  %v1462_v25 = vld [vmem:[#allocation2 + $0x10] sm:$0xf0]  ;;  %v1461_v37 = vor.u32 %v2089_v19, %v1460_v18 }
  0x25   :  { %518 = vmatpush.bf16.msra.mxu1 %v1637_v62  ;;  %v1588_v26 = vld [vmem:[#allocation2 + $0x100] sm:$0xf]  ;;  %v1580_v27 = vld [vmem:[#allocation2 + $0xe8] sm:$0xf]  ;;  %v2118_v29 = vld [vmem:[#allocation2 + $0xf4] sm:$0xf0]  ;;  %v1709_v36 = vor.u32 %v2150_v23, %v1708_v22  ;;  %v1465_v40 = vor.u32 %v2087_v21, %v1462_v25 }
  0x26   :  { %546 = vmatpush.bf16.msra.mxu3 %v1641_v1  ;;  %v2148_v30 = vld [vmem:[#allocation2 + $0x1ec] sm:$0xf]  ;;  %v1710_v31 = vld [vmem:[#allocation2 + $0x1f8] sm:$0x30]  ;;  %v2121_v33 = vld [vmem:[#allocation2 + $0x10c] sm:$0xf0]  ;;  %v1581_v41 = vor.u32 %v2118_v29, %v1580_v27 }
  0x27   :  { %505 = vmatpush.bf16.msra.mxu0 %v1493_v4  ;;  %533 = vmatpush.bf16.msra.mxu2 %v1497_v8  ;;  %v2116_v34 = vld [vmem:[#allocation2 + $0xec] sm:$0xf]  ;;  %v1582_v35 = vld [vmem:[#allocation2 + $0xf8] sm:$0xf0]  ;;  %v2119_v38 = vld [vmem:[#allocation2 + $0x104] sm:$0xf]  ;;  %v1713_v42 = vor.u32 %v2148_v30, %v1710_v31  ;;  %v1589_v45 = vor.u32 %v2121_v33, %v1588_v26 }
  0x28   :  { %v1590_v39 = vld [vmem:[#allocation2 + $0x110] sm:$0xf0]  ;;  %v87_v43 = vld [vmem:[%s2540_s0] sm:$0xff]  ;;  %v1585_v46 = vor.u32 %v2116_v34, %v1582_v35  ;;  %v88_v47 = vld [vmem:[%s2540_s0 + $0x8] sm:$0xff]  ;;  %v495_v51 = vsel %vm487_vm0, %v1709_v36, 0 }
  0x29   :  { %519 = vmatpush.bf16.msra.mxu1 %v1621_v12  ;;  %v89_v44 = vld [vmem:[%s2540_s0 + $0x10] sm:$0xff]  ;;  %v90_v48 = vld [vmem:[%s2540_s0 + $0x18] sm:$0xff]  ;;  %v1564_v49 = vld [vmem:[#allocation2 + $0xc8] sm:$0xf]  ;;  %v1593_v50 = vor.u32 %v2119_v38, %v1590_v39  ;;  %v498_v58 = vsel %vm487_vm0, %v1713_v42, 0 }
  0x2a   :  { %547 = vmatpush.bf16.msra.mxu3 %v1625_v16  ;;  %v2114_v52 = vld [vmem:[#allocation2 + $0xd4] sm:$0xf0]  ;;  %v2112_v53 = vld [vmem:[#allocation2 + $0xcc] sm:$0xf]  ;;  %v2460_v54 = vpack.c.bf16 %v89_v44, %v87_v43  ;;  %v1566_v55 = vld [vmem:[#allocation2 + $0xd8] sm:$0xf0]  ;;  %v2463_v59 = vpack.c.bf16 %v90_v48, %v88_v47 }
  0x2b   :  { %506 = vmatpush.bf16.msra.mxu0 %v1477_v20  ;;  %534 = vmatpush.bf16.msra.mxu2 %v1481_v24  ;;  %v1692_v56 = vld [vmem:[#allocation2 + $0x1c8] sm:$0xf]  ;;  %v2146_v57 = vld [vmem:[#allocation2 + $0x1d4] sm:$0xf0]  ;;  %v2144_v60 = vld [vmem:[#allocation2 + $0x1cc] sm:$0xf]  ;;  %v1565_v62 = vor.u32 %v2114_v52, %v1564_v49  ;;  %v1569_v63 = vor.u32 %v2112_v53, %v1566_v55 }
  0x2c   :  { %v1694_v61 = vld [vmem:[#allocation2 + $0x1d8] sm:$0xf0]  ;;  %v1693_v0 = vor.u32 %v2146_v57, %v1692_v56  ;;  %v1548_v1 = vld [vmem:[#allocation2 + $0xa8] sm:$0xf]  ;;  %v2110_v2 = vld [vmem:[#allocation2 + $0xb4] sm:$0xf0] }
  0x2d   :  { %520 = vmatpush.bf16.msra.mxu1 %v1605_v28  ;;  %v2108_v3 = vld [vmem:[#allocation2 + $0xac] sm:$0xf]  ;;  %v1697_v4 = vor.u32 %v2144_v60, %v1694_v61  ;;  %v1550_v5 = vld [vmem:[#allocation2 + $0xb8] sm:$0xf0]  ;;  %v1676_v6 = vld [vmem:[#allocation2 + $0x1a8] sm:$0xf]  ;;  %v1549_v10 = vor.u32 %v2110_v2, %v1548_v1 }
  0x2e   :  { %548 = vmatpush.bf16.msra.mxu3 %v1609_v32  ;;  %v2142_v7 = vld [vmem:[#allocation2 + $0x1b4] sm:$0xf0]  ;;  %v2140_v8 = vld [vmem:[#allocation2 + $0x1ac] sm:$0xf]  ;;  %v1678_v9 = vld [vmem:[#allocation2 + $0x1b8] sm:$0xf0]  ;;  %v1553_v11 = vor.u32 %v2108_v3, %v1550_v5 }
  0x2f   :  { %507 = vmatpush.bf16.msra.mxu0 %v1461_v37  ;;  %535 = vmatpush.bf16.msra.mxu2 %v1465_v40  ;;  %v1677_v12 = vor.u32 %v2142_v7, %v1676_v6  ;;  %v1532_v13 = vld [vmem:[#allocation2 + $0x88] sm:$0xf]  ;;  %v2106_v14 = vld [vmem:[#allocation2 + $0x94] sm:$0xf0]  ;;  %v2104_v15 = vld [vmem:[#allocation2 + $0x8c] sm:$0xf]  ;;  %v1681_v16 = vor.u32 %v2140_v8, %v1678_v9 }
  0x30   :  { %v1534_v17 = vld [vmem:[#allocation2 + $0x98] sm:$0xf0]  ;;  %v1660_v18 = vld [vmem:[#allocation2 + $0x188] sm:$0xf]  ;;  %v2138_v19 = vld [vmem:[#allocation2 + $0x194] sm:$0xf0]  ;;  %v1533_v22 = vor.u32 %v2106_v14, %v1532_v13 }
  0x31   :  { %521 = vmatpush.bf16.msra.mxu1 %v1589_v45  ;;  %v2136_v20 = vld [vmem:[#allocation2 + $0x18c] sm:$0xf]  ;;  %v1662_v21 = vld [vmem:[#allocation2 + $0x198] sm:$0xf0]  ;;  %v1537_v23 = vor.u32 %v2104_v15, %v1534_v17  ;;  %v1661_v24 = vor.u32 %v2138_v19, %v1660_v18  ;;  %v1516_v25 = vld [vmem:[#allocation2 + $0x68] sm:$0xf] }
  0x32   :  { %549 = vmatpush.bf16.msra.mxu3 %v1593_v50  ;;  %508 = vmatmul.bf16.vlgmr.msra.gmra.mxu0 %v2460_v54  ;;  %v2102_v26 = vld [vmem:[#allocation2 + $0x74] sm:$0xf0]  ;;  %v2100_v27 = vld [vmem:[#allocation2 + $0x6c] sm:$0xf]  ;;  %v1665_v28 = vor.u32 %v2136_v20, %v1662_v21  ;;  %v1518_v29 = vld [vmem:[#allocation2 + $0x78] sm:$0xf0] }
  0x33   :  { %556 = vmatpush.bf16.msrb.mxu0 %v1581_v41  ;;  %584 = vmatpush.bf16.msrb.mxu2 %v1585_v46  ;;  %v1644_v30 = vld [vmem:[#allocation2 + $0x168] sm:$0xf]  ;;  %v2134_v31 = vld [vmem:[#allocation2 + $0x174] sm:$0xf0]  ;;  %v2132_v32 = vld [vmem:[#allocation2 + $0x16c] sm:$0xf]  ;;  %v1517_v34 = vor.u32 %v2102_v26, %v1516_v25  ;;  %v1521_v35 = vor.u32 %v2100_v27, %v1518_v29 }
  0x34   :  { %536 = vmatmul.bf16.vlgmr.msra.gmra.mxu2 %v2460_v54  ;;  %1714 = vmatmul.msk.bf16.vlgmr.msra.gmra.mxu1 %vm483_vm1, %v2463_v59  ;;  %v1646_v33 = vld [vmem:[#allocation2 + $0x178] sm:$0xf0]  ;;  %v1645_v36 = vor.u32 %v2134_v31, %v1644_v30  ;;  %v1500_v37 = vld [vmem:[#allocation2 + $0x48] sm:$0xf]  ;;  %v2098_v38 = vld [vmem:[#allocation2 + $0x54] sm:$0xf0] }
  0x35   :  { %570 = vmatpush.bf16.msrb.mxu1 %v495_v51  ;;  %1715 = vmatmul.msk.bf16.vlgmr.msra.gmra.mxu3 %vm483_vm1, %v2463_v59  ;;  %v2096_v39 = vld [vmem:[#allocation2 + $0x4c] sm:$0xf]  ;;  %v1649_v40 = vor.u32 %v2132_v32, %v1646_v33  ;;  %v1502_v41 = vld [vmem:[#allocation2 + $0x58] sm:$0xf0]  ;;  %v1628_v42 = vld [vmem:[#allocation2 + $0x148] sm:$0xf]  ;;  %v1501_v46 = vor.u32 %v2098_v38, %v1500_v37 }
  0x36   :  { %598 = vmatpush.bf16.msrb.mxu3 %v498_v58  ;;  %v2130_v43 = vld [vmem:[#allocation2 + $0x154] sm:$0xf0]  ;;  %v2128_v44 = vld [vmem:[#allocation2 + $0x14c] sm:$0xf]  ;;  %v1630_v45 = vld [vmem:[#allocation2 + $0x158] sm:$0xf0]  ;;  %v1505_v47 = vor.u32 %v2096_v39, %v1502_v41 }
  0x37   :  { %557 = vmatpush.bf16.msrb.mxu0 %v1565_v62  ;;  %585 = vmatpush.bf16.msrb.mxu2 %v1569_v63  ;;  %v1629_v48 = vor.u32 %v2130_v43, %v1628_v42  ;;  %v1484_v49 = vld [vmem:[#allocation2 + $0x28] sm:$0xf]  ;;  %v2094_v50 = vld [vmem:[#allocation2 + $0x34] sm:$0xf0]  ;;  %v2092_v51 = vld [vmem:[#allocation2 + $0x2c] sm:$0xf]  ;;  %v1633_v52 = vor.u32 %v2128_v44, %v1630_v45 }
  0x38   :  { %v1486_v53 = vld [vmem:[#allocation2 + $0x38] sm:$0xf0]  ;;  %v1612_v55 = vld [vmem:[#allocation2 + $0x128] sm:$0xf]  ;;  %v2126_v56 = vld [vmem:[#allocation2 + $0x134] sm:$0xf0]  ;;  %v1485_v60 = vor.u32 %v2094_v50, %v1484_v49 }
  0x39   :  { %571 = vmatpush.bf16.msrb.mxu1 %v1693_v0  ;;  %v2124_v57 = vld [vmem:[#allocation2 + $0x12c] sm:$0xf]  ;;  %v1614_v58 = vld [vmem:[#allocation2 + $0x138] sm:$0xf0]  ;;  %v1468_v61 = vld [vmem:[#allocation2 + $0x8] sm:$0xf]  ;;  %v1489_v62 = vor.u32 %v2092_v51, %v1486_v53  ;;  %v1613_v63 = vor.u32 %v2126_v56, %v1612_v55 }
  0x3a   :  { %599 = vmatpush.bf16.msrb.mxu3 %v1697_v4  ;;  %v2090_v0 = vld [vmem:[#allocation2 + $0x14] sm:$0xf0]  ;;  %v2088_v1 = vld [vmem:[#allocation2 + $0xc] sm:$0xf]  ;;  %v1470_v2 = vld [vmem:[#allocation2 + $0x18] sm:$0xf0]  ;;  %v1617_v3 = vor.u32 %v2124_v57, %v1614_v58 }
  0x3b   :  { %558 = vmatpush.bf16.msrb.mxu0 %v1549_v10  ;;  %586 = vmatpush.bf16.msrb.mxu2 %v1553_v11  ;;  %v1596_v4 = vld [vmem:[#allocation2 + $0x108] sm:$0xf]  ;;  %v2122_v5 = vld [vmem:[#allocation2 + $0x114] sm:$0xf0]  ;;  %v2120_v6 = vld [vmem:[#allocation2 + $0x10c] sm:$0xf]  ;;  %v1469_v10 = vor.u32 %v2090_v0, %v1468_v61  ;;  %v1473_v13 = vor.u32 %v2088_v1, %v1470_v2 }
  0x3c   :  { %v1598_v7 = vld [vmem:[#allocation2 + $0x118] sm:$0xf0]  ;;  %v1776_v8 = vld [vmem:[#allocation5 + $0x70] sm:$0xf]  ;;  %v2166_v9 = vld [vmem:[#allocation5 + $0x74] sm:$0xf0]  ;;  %v1597_v14 = vor.u32 %v2122_v5, %v1596_v4 }
  0x3d   :  { %572 = vmatpush.bf16.msrb.mxu1 %v1677_v12  ;;  %v1840_v11 = vld [vmem:[#allocation5 + $0xf0] sm:$0xf]  ;;  %v2182_v12 = vld [vmem:[#allocation5 + $0xf4] sm:$0xf0]  ;;  %v1601_v15 = vor.u32 %v2120_v6, %v1598_v7  ;;  %v1768_v17 = vld [vmem:[#allocation5 + $0x60] sm:$0xf] }
  0x3e   :  { %600 = vmatpush.bf16.msrb.mxu3 %v1681_v16  ;;  %v1777_v16 = vor.u32 %v2166_v9, %v1776_v8  ;;  %v2164_v18 = vld [vmem:[#allocation5 + $0x64] sm:$0xf0]  ;;  %v1841_v19 = vor.u32 %v2182_v12, %v1840_v11  ;;  %v1832_v20 = vld [vmem:[#allocation5 + $0xe0] sm:$0xf]  ;;  %v1824_v26 = vld [vmem:[#allocation5 + $0xd0] sm:$0xf] }
  0x3f   :  { %559 = vmatpush.bf16.msrb.mxu0 %v1533_v22  ;;  %587 = vmatpush.bf16.msrb.mxu2 %v1537_v23  ;;  %v2180_v21 = vld [vmem:[#allocation5 + $0xe4] sm:$0xf0]  ;;  %v1769_v22 = vor.u32 %v2164_v18, %v1768_v17  ;;  %v1760_v23 = vld [vmem:[#allocation5 + $0x50] sm:$0xf]  ;;  %v2178_v27 = vld [vmem:[#allocation5 + $0xd4] sm:$0xf0] }
  0x40   :  { %v1833_v25 = vor.u32 %v2180_v21, %v1832_v20  ;;  %v1752_v29 = vld [vmem:[#allocation5 + $0x40] sm:$0xf]  ;;  %v2160_v30 = vld [vmem:[#allocation5 + $0x44] sm:$0xf0]  ;;  %v1825_v31 = vor.u32 %v2178_v27, %v1824_v26  ;;  %v1808_v37 = vld [vmem:[#allocation5 + $0xb0] sm:$0xf] }
  0x41   :  { %573 = vmatpush.bf16.msrb.mxu1 %v1661_v24  ;;  %v2162_v24 = vld [vmem:[#allocation5 + $0x54] sm:$0xf0]  ;;  %v1816_v32 = vld [vmem:[#allocation5 + $0xc0] sm:$0xf]  ;;  %v2176_v33 = vld [vmem:[#allocation5 + $0xc4] sm:$0xf0] }
  0x42   :  { %601 = vmatpush.bf16.msrb.mxu3 %v1665_v28  ;;  %v1761_v28 = vor.u32 %v2162_v24, %v1760_v23  ;;  %v2174_v38 = vld [vmem:[#allocation5 + $0xb4] sm:$0xf0]  ;;  %v1800_v42 = vld [vmem:[#allocation5 + $0xa0] sm:$0xf]  ;;  %v2172_v43 = vld [vmem:[#allocation5 + $0xa4] sm:$0xf0] }
  0x43   :  { %560 = vmatpush.bf16.msrb.mxu0 %v1517_v34  ;;  %588 = vmatpush.bf16.msrb.mxu2 %v1521_v35  ;;  %v1753_v34 = vor.u32 %v2160_v30, %v1752_v29  ;;  %v2158_v35 = vld [vmem:[#allocation5 + $0x34] sm:$0xf0]  ;;  %v1809_v41 = vor.u32 %v2174_v38, %v1808_v37  ;;  %v1728_v45 = vld [vmem:[#allocation5 + $0x10] sm:$0xf]  ;;  %v1720_v49 = vld [vmem:[#allocation5] sm:$0xf] }
  0x44   :  { %v2152_v50 = vld [vmem:[#allocation5 + $0x4] sm:$0xf0]  ;;  %v2198_v53 = vld [vmem:[#allocation5 + $0x174] sm:$0xf0]  ;;  %v2165_v55 = vld [vmem:[#allocation5 + $0x74] sm:$0xf] }
  0x45   :  { %574 = vmatpush.bf16.msrb.mxu1 %v1645_v36  ;;  %v1817_v36 = vor.u32 %v2176_v33, %v1816_v32  ;;  %v1721_v51 = vor.u32 %v2152_v50, %v1720_v49  ;;  %v1778_v57 = vld [vmem:[#allocation5 + $0x78] sm:$0xf0]  ;;  %v1792_v58 = vld [vmem:[#allocation5 + $0x90] sm:$0xf]  ;;  %v2196_v0 = vld [vmem:[#allocation5 + $0x164] sm:$0xf0] }
  0x46   :  { %602 = vmatpush.bf16.msrb.mxu3 %v1649_v40  ;;  %v2156_v40 = vld [vmem:[#allocation5 + $0x24] sm:$0xf0]  ;;  %v1781_v61 = vor.u32 %v2165_v55, %v1778_v57  ;;  %v2163_v1 = vld [vmem:[#allocation5 + $0x64] sm:$0xf]  ;;  %v1784_v4 = vld [vmem:[#allocation5 + $0x80] sm:$0xf] }
  0x47   :  { %561 = vmatpush.bf16.msrb.mxu0 %v1501_v46  ;;  %589 = vmatpush.bf16.msrb.mxu2 %v1505_v47  ;;  %v2154_v46 = vld [vmem:[#allocation5 + $0x14] sm:$0xf0]  ;;  %v1801_v47 = vor.u32 %v2172_v43, %v1800_v42  ;;  %v2168_v6 = vld [vmem:[#allocation5 + $0x84] sm:$0xf0]  ;;  %v1968_v7 = vld [vmem:[#allocation5 + $0x1f0] sm:$0xf] }
  0x48   :  { %v2214_v8 = vld [vmem:[#allocation5 + $0x1f4] sm:$0xf0]  ;;  %v1785_v9 = vor.u32 %v2168_v6, %v1784_v4  ;;  %v2181_v11 = vld [vmem:[#allocation5 + $0xf4] sm:$0xf]  ;;  %v1842_v12 = vld [vmem:[#allocation5 + $0xf8] sm:$0xf0] }
  0x49   :  { %575 = vmatpush.bf16.msrb.mxu1 %v1629_v48  ;;  %v1729_v48 = vor.u32 %v2154_v46, %v1728_v45  ;;  %v1762_v18 = vld [vmem:[#allocation5 + $0x58] sm:$0xf0]  ;;  %v1960_v20 = vld [vmem:[#allocation5 + $0x1e0] sm:$0xf]  ;;  %v2212_v21 = vld [vmem:[#allocation5 + $0x1e4] sm:$0xf0] }
  0x4a   :  { %603 = vmatpush.bf16.msrb.mxu3 %v1633_v52  ;;  %v1904_v52 = vld [vmem:[#allocation5 + $0x170] sm:$0xf]  ;;  %v1961_v23 = vor.u32 %v2212_v21, %v1960_v20  ;;  %v1834_v24 = vld [vmem:[#allocation5 + $0xe8] sm:$0xf0]  ;;  %v1880_v26 = vld [vmem:[#allocation5 + $0x140] sm:$0xf] }
  0x4b   :  { %562 = vmatpush.bf16.msrb.mxu0 %v1485_v60  ;;  %590 = vmatpush.bf16.msrb.mxu2 %v1489_v62  ;;  %v1905_v56 = vor.u32 %v2198_v53, %v1904_v52  ;;  %v2170_v60 = vld [vmem:[#allocation5 + $0x94] sm:$0xf0]  ;;  %v2192_v27 = vld [vmem:[#allocation5 + $0x144] sm:$0xf0]  ;;  %v1754_v30 = vld [vmem:[#allocation5 + $0x48] sm:$0xf0] }
  0x4c   :  { %v1793_v62 = vor.u32 %v2170_v60, %v1792_v58  ;;  %v1881_v29 = vor.u32 %v2192_v27, %v1880_v26  ;;  %v1952_v32 = vld [vmem:[#allocation5 + $0x1d0] sm:$0xf]  ;;  %v2210_v33 = vld [vmem:[#allocation5 + $0x1d4] sm:$0xf0]  ;;  %v1944_v42 = vld [vmem:[#allocation5 + $0x1c0] sm:$0xf] }
  0x4d   :  { %576 = vmatpush.bf16.msrb.mxu1 %v1613_v63  ;;  %v1896_v63 = vld [vmem:[#allocation5 + $0x160] sm:$0xf]  ;;  %v1872_v37 = vld [vmem:[#allocation5 + $0x130] sm:$0xf]  ;;  %v2190_v38 = vld [vmem:[#allocation5 + $0x134] sm:$0xf0] }
  0x4e   :  { %604 = vmatpush.bf16.msrb.mxu3 %v1617_v3  ;;  %v1897_v2 = vor.u32 %v2196_v0, %v1896_v63  ;;  %v1770_v3 = vld [vmem:[#allocation5 + $0x68] sm:$0xf0]  ;;  %v2208_v43 = vld [vmem:[#allocation5 + $0x1c4] sm:$0xf0]  ;;  %v2155_v50 = vld [vmem:[#allocation5 + $0x24] sm:$0xf] }
  0x4f   :  { %563 = vmatpush.bf16.msrb.mxu0 %v1469_v10  ;;  %591 = vmatpush.bf16.msrb.mxu2 %v1473_v13  ;;  %v1773_v5 = vor.u32 %v2163_v1, %v1770_v3  ;;  %v1969_v10 = vor.u32 %v2214_v8, %v1968_v7  ;;  %v1845_v13 = vor.u32 %v2181_v11, %v1842_v12  ;;  %v1818_v46 = vld [vmem:[#allocation5 + $0xc8] sm:$0xf0]  ;;  %v2188_v49 = vld [vmem:[#allocation5 + $0x124] sm:$0xf0]  ;;  %v1936_v55 = vld [vmem:[#allocation5 + $0x1b0] sm:$0xf] }
  0x50   :  { %v1945_v45 = vor.u32 %v2208_v43, %v1944_v42  ;;  %v1738_v52 = vld [vmem:[#allocation5 + $0x28] sm:$0xf0]  ;;  %v2173_v57 = vld [vmem:[#allocation5 + $0xb4] sm:$0xf]  ;;  %v1810_v60 = vld [vmem:[#allocation5 + $0xb8] sm:$0xf0] }
  0x51   :  { %577 = vmatpush.bf16.msrb.mxu1 %v1597_v14  ;;  %v1888_v14 = vld [vmem:[#allocation5 + $0x150] sm:$0xf]  ;;  %v1741_v53 = vor.u32 %v2155_v50, %v1738_v52  ;;  %v2186_v63 = vld [vmem:[#allocation5 + $0x114] sm:$0xf0]  ;;  %v2153_v0 = vld [vmem:[#allocation5 + $0x14] sm:$0xf] }
  0x52   :  { %605 = vmatpush.bf16.msrb.mxu3 %v1601_v15  ;;  %564 = vmatmul.bf16.vlgmr.msrb.gmra.mxu0 %v2460_v54  ;;  %v2194_v15 = vld [vmem:[#allocation5 + $0x154] sm:$0xf0]  ;;  %v1928_v3 = vld [vmem:[#allocation5 + $0x1a0] sm:$0xf]  ;;  %v2204_v4 = vld [vmem:[#allocation5 + $0x1a4] sm:$0xf0] }
  0x53   :  { %1014 = vmatpush.bf16.msra.mxu0 %v1777_v16  ;;  %592 = vmatmul.bf16.vlgmr.msrb.gmra.mxu2 %v2460_v54  ;;  %v1744_v54 = vld [vmem:[#allocation5 + $0x30] sm:$0xf]  ;;  %v2161_v16 = vld [vmem:[#allocation5 + $0x54] sm:$0xf]  ;;  %v1889_v17 = vor.u32 %v2194_v15, %v1888_v14  ;;  %v1929_v6 = vor.u32 %v2204_v4, %v1928_v3  ;;  %v2171_v7 = vld [vmem:[#allocation5 + $0xa4] sm:$0xf] }
  0x54   :  { %1716 = vmatmul.msk.bf16.vlgmr.msrb.gmra.mxu1 %vm483_vm1, %v2463_v59  ;;  %v1745_v39 = vor.u32 %v2158_v35, %v1744_v54  ;;  %1042 = vmatpush.bf16.msra.mxu2 %v1905_v56  ;;  %v1953_v54 = vor.u32 %v2210_v33, %v1952_v32  ;;  %v1826_v35 = vld [vmem:[#allocation5 + $0xd8] sm:$0xf0]  ;;  %v2206_v56 = vld [vmem:[#allocation5 + $0x1b4] sm:$0xf0]  ;;  %v1802_v8 = vld [vmem:[#allocation5 + $0xa8] sm:$0xf0] }
  0x55   :  { %1028 = vmatpush.bf16.msra.mxu1 %v1841_v19  ;;  %1717 = vmatmul.msk.bf16.vlgmr.msrb.gmra.mxu3 %vm483_vm1, %v2463_v59  ;;  %v1736_v59 = vld [vmem:[#allocation5 + $0x20] sm:$0xf]  ;;  %v1765_v19 = vor.u32 %v2161_v16, %v1762_v18  ;;  %v1937_v58 = vor.u32 %v2206_v56, %v1936_v55  ;;  %v2184_v12 = vld [vmem:[#allocation5 + $0x104] sm:$0xf0]  ;;  %v1722_v15 = vld [vmem:[#allocation5 + $0x8] sm:$0xf0] }
  0x56   :  { %v1737_v44 = vor.u32 %v2156_v40, %v1736_v59  ;;  %1056 = vmatpush.bf16.msra.mxu3 %v1969_v10  ;;  %v1873_v59 = vor.u32 %v2190_v38, %v1872_v37  ;;  %v1746_v40 = vld [vmem:[#allocation5 + $0x38] sm:$0xf0]  ;;  %v1805_v10 = vor.u32 %v2171_v7, %v1802_v8  ;;  %v1848_v11 = vld [vmem:[#allocation5 + $0x100] sm:$0xf]  ;;  %v2197_v16 = vld [vmem:[#allocation5 + $0x174] sm:$0xf] }
  0x57   :  { %1015 = vmatpush.bf16.msra.mxu0 %v1769_v22  ;;  %v2179_v22 = vld [vmem:[#allocation5 + $0xe4] sm:$0xf]  ;;  %v1849_v14 = vor.u32 %v2184_v12, %v1848_v11  ;;  %v1920_v20 = vld [vmem:[#allocation5 + $0x190] sm:$0xf]  ;;  %v2202_v21 = vld [vmem:[#allocation5 + $0x194] sm:$0xf0] }
  0x58   :  { %1043 = vmatpush.bf16.msra.mxu2 %v1897_v2  ;;  %v1730_v2 = vld [vmem:[#allocation5 + $0x18] sm:$0xf0]  ;;  %v1912_v32 = vld [vmem:[#allocation5 + $0x180] sm:$0xf]  ;;  %v2200_v33 = vld [vmem:[#allocation5 + $0x184] sm:$0xf0] }
  0x59   :  { %1029 = vmatpush.bf16.msra.mxu1 %v1833_v25  ;;  %v1837_v25 = vor.u32 %v2179_v22, %v1834_v24  ;;  %v2169_v22 = vld [vmem:[#allocation5 + $0x94] sm:$0xf]  ;;  %v1921_v24 = vor.u32 %v2202_v21, %v1920_v20  ;;  %v1882_v55 = vld [vmem:[#allocation5 + $0x148] sm:$0xf0]  ;;  %v2207_v7 = vld [vmem:[#allocation5 + $0x1c4] sm:$0xf] }
  0x5a   :  { %1057 = vmatpush.bf16.msra.mxu3 %v1961_v23  ;;  %v2213_v37 = vld [vmem:[#allocation5 + $0x1f4] sm:$0xf]  ;;  %v1946_v8 = vld [vmem:[#allocation5 + $0x1c8] sm:$0xf0] }
  0x5b   :  { %1016 = vmatpush.bf16.msra.mxu0 %v1761_v28  ;;  %v2159_v28 = vld [vmem:[#allocation5 + $0x44] sm:$0xf]  ;;  %v1949_v12 = vor.u32 %v2207_v7, %v1946_v8 }
  0x5c   :  { %1044 = vmatpush.bf16.msra.mxu2 %v1889_v17  ;;  %v1906_v17 = vld [vmem:[#allocation5 + $0x178] sm:$0xf0]  ;;  %v2215_v7 = vld [vmem:[#allocation7] sm:$0xff] }
  0x5d   :  { %1030 = vmatpush.bf16.msra.mxu1 %v1825_v31  ;;  %v1757_v31 = vor.u32 %v2159_v28, %v1754_v30  ;;  %v1898_v30 = vld [vmem:[#allocation5 + $0x168] sm:$0xf0]  ;;  %v2227_v8 = vld [vmem:[#allocation7 + $0x60] sm:$0xff] }
  0x5e   :  { %1058 = vmatpush.bf16.msra.mxu3 %v1953_v54  ;;  %v1913_v54 = vor.u32 %v2200_v33, %v1912_v32  ;;  %v2201_v32 = vld [vmem:[#allocation5 + $0x194] sm:$0xf]  ;;  %v1922_v33 = vld [vmem:[#allocation5 + $0x198] sm:$0xf0] }
  0x5f   :  { %1017 = vmatpush.bf16.msra.mxu0 %v1753_v34  ;;  %v2177_v34 = vld [vmem:[#allocation5 + $0xd4] sm:$0xf] }
  0x60   :  { %1045 = vmatpush.bf16.msra.mxu2 %v1881_v29  ;;  %v2195_v29 = vld [vmem:[#allocation5 + $0x164] sm:$0xf] }
  0x61   :  { %1031 = vmatpush.bf16.msra.mxu1 %v1817_v36  ;;  %v1829_v36 = vor.u32 %v2177_v34, %v1826_v35  ;;  %v2167_v35 = vld [vmem:[#allocation5 + $0x84] sm:$0xf] }
  0x62   :  { %1059 = vmatpush.bf16.msra.mxu3 %v1945_v45 }
  0x63   :  { %1018 = vmatpush.bf16.msra.mxu0 %v1745_v39  ;;  %v2157_v39 = vld [vmem:[#allocation5 + $0x34] sm:$0xf] }
  0x64   :  { %1046 = vmatpush.bf16.msra.mxu2 %v1873_v59 }
  0x65   :  { %1032 = vmatpush.bf16.msra.mxu1 %v1809_v41  ;;  %v1749_v41 = vor.u32 %v2157_v39, %v1746_v40  ;;  %v1970_v39 = vld [vmem:[#allocation5 + $0x1f8] sm:$0xf0]  ;;  %v2193_v40 = vld [vmem:[#allocation5 + $0x154] sm:$0xf] }
  0x66   :  { %1060 = vmatpush.bf16.msra.mxu3 %v1937_v58  ;;  %v1973_v59 = vor.u32 %v2213_v37, %v1970_v39  ;;  %v2199_v37 = vld [vmem:[#allocation5 + $0x184] sm:$0xf] }
  0x67   :  { %1019 = vmatpush.bf16.msra.mxu0 %v1737_v44  ;;  %v2175_v44 = vld [vmem:[#allocation5 + $0xc4] sm:$0xf] }
  0x69   :  { %1033 = vmatpush.bf16.msra.mxu1 %v1801_v47  ;;  %v1821_v47 = vor.u32 %v2175_v44, %v1818_v46  ;;  %v2211_v46 = vld [vmem:[#allocation5 + $0x1e4] sm:$0xf] }
  0x6a   :  { %1061 = vmatpush.bf16.msra.mxu3 %v1929_v6 }
  0x6b   :  { %1020 = vmatpush.bf16.msra.mxu0 %v1729_v48  ;;  %v1864_v48 = vld [vmem:[#allocation5 + $0x120] sm:$0xf] }
  0x6d   :  { %1034 = vmatpush.bf16.msra.mxu1 %v1793_v62  ;;  %v1856_v62 = vld [vmem:[#allocation5 + $0x110] sm:$0xf] }
  0x6e   :  { %v1857_v1 = vor.u32 %v2186_v63, %v1856_v62  ;;  %1062 = vmatpush.bf16.msra.mxu3 %v1921_v24  ;;  %v1954_v62 = vld [vmem:[#allocation5 + $0x1d8] sm:$0xf0]  ;;  %v2203_v24 = vld [vmem:[#allocation5 + $0x1a4] sm:$0xf] }
  0x6f   :  { %1021 = vmatpush.bf16.msra.mxu0 %v1721_v51  ;;  %v1865_v51 = vor.u32 %v2188_v49, %v1864_v48 }
  0x71   :  { %1035 = vmatpush.bf16.msra.mxu1 %v1785_v9  ;;  %1047 = vmatpush.bf16.msra.mxu2 %v1865_v51  ;;  %v2480_v9 = vld [vmem:[%s2542_s2] sm:$0xf] }
  0x72   :  { %v159_v23 = vperm.slane %v2480_v9, 0  ;;  %1063 = vmatpush.bf16.msra.mxu3 %v1913_v54  ;;  %v160_v42 = vperm.slane %v2480_v9, 1 }
  0x73   :  { %1070 = vmatpush.bf16.msrb.mxu0 %v1781_v61  ;;  %v1813_v61 = vor.u32 %v2173_v57, %v1810_v60 }
  0x75   :  { %1084 = vmatpush.bf16.msrb.mxu1 %v1845_v13  ;;  %1048 = vmatpush.bf16.msra.mxu2 %v1857_v1  ;;  %v2151_v13 = vld [vmem:[#allocation5 + $0x4] sm:$0xf]  ;;  %v2189_v1 = vld [vmem:[#allocation5 + $0x134] sm:$0xf] }
  0x76   :  { %v1725_v18 = vor.u32 %v2151_v13, %v1722_v15  ;;  %1112 = vmatpush.bf16.msrb.mxu3 %v1973_v59  ;;  %v2187_v13 = vld [vmem:[#allocation5 + $0x124] sm:$0xf] }
  0x77   :  { %1071 = vmatpush.bf16.msrb.mxu0 %v1773_v5  ;;  %v1733_v5 = vor.u32 %v2153_v0, %v1730_v2  ;;  %v1874_v2 = vld [vmem:[#allocation5 + $0x138] sm:$0xf0] }
  0x78   :  { %v1877_v4 = vor.u32 %v2189_v1, %v1874_v2  ;;  %v2218_v1 = vld [vmem:[#allocation7 + $0x18] sm:$0xff] }
  0x79   :  { %1085 = vmatpush.bf16.msrb.mxu1 %v1837_v25  ;;  %1049 = vmatpush.bf16.msra.mxu2 %v1849_v14  ;;  %v1794_v25 = vld [vmem:[#allocation5 + $0x98] sm:$0xf0]  ;;  %v1866_v14 = vld [vmem:[#allocation5 + $0x128] sm:$0xf0] }
  0x7a   :  { %v1797_v27 = vor.u32 %v2169_v22, %v1794_v25  ;;  %v2185_v22 = vld [vmem:[#allocation5 + $0x114] sm:$0xf]  ;;  %v2230_v2 = vld [vmem:[#allocation7 + $0x78] sm:$0xff] }
  0x7b   :  { %1072 = vmatpush.bf16.msrb.mxu0 %v1765_v19  ;;  %v1909_v19 = vor.u32 %v2197_v16, %v1906_v17  ;;  %v1869_v17 = vor.u32 %v2187_v13, %v1866_v14  ;;  %v2224_v14 = vld [vmem:[#allocation7 + $0x48] sm:$0xff] }
  0x7d   :  { %1086 = vmatpush.bf16.msrb.mxu1 %v1829_v36  ;;  %1098 = vmatpush.bf16.msrb.mxu2 %v1909_v19  ;;  %v1786_v36 = vld [vmem:[#allocation5 + $0x88] sm:$0xf0]  ;;  %v1938_v19 = vld [vmem:[#allocation5 + $0x1b8] sm:$0xf0] }
  0x7e   :  { %v1789_v38 = vor.u32 %v2167_v35, %v1786_v36  ;;  %v161_v35 = vperm.slane %v2480_v9, 2 }
  0x7f   :  { %1073 = vmatpush.bf16.msrb.mxu0 %v1757_v31  ;;  %v1901_v31 = vor.u32 %v2195_v29, %v1898_v30  ;;  %v1850_v29 = vld [vmem:[#allocation5 + $0x108] sm:$0xf0] }
  0x81   :  { %1087 = vmatpush.bf16.msrb.mxu1 %v1821_v47  ;;  %1099 = vmatpush.bf16.msrb.mxu2 %v1901_v31  ;;  %v1962_v47 = vld [vmem:[#allocation5 + $0x1e8] sm:$0xf0] }
  0x82   :  { %v1965_v50 = vor.u32 %v2211_v46, %v1962_v47 }
  0x83   :  { %1074 = vmatpush.bf16.msrb.mxu0 %v1749_v41  ;;  %v1890_v41 = vld [vmem:[#allocation5 + $0x158] sm:$0xf0] }
  0x84   :  { %v1893_v43 = vor.u32 %v2193_v40, %v1890_v41  ;;  %1113 = vmatpush.bf16.msrb.mxu3 %v1965_v50  ;;  %v162_v41 = vperm.slane %v2480_v9, 3 }
  0x85   :  { %1088 = vmatpush.bf16.msrb.mxu1 %v1813_v61  ;;  %v2209_v61 = vld [vmem:[#allocation5 + $0x1d4] sm:$0xf] }
  0x86   :  { %1100 = vmatpush.bf16.msrb.mxu2 %v1893_v43  ;;  %v1957_v63 = vor.u32 %v2209_v61, %v1954_v62  ;;  %v2222_v61 = vld [vmem:[#allocation7 + $0x38] sm:$0xff]  ;;  %v2221_v62 = vld [vmem:[#allocation7 + $0x30] sm:$0xff] }
  0x87   :  { %1075 = vmatpush.bf16.msrb.mxu0 %v1741_v53  ;;  %v2191_v53 = vld [vmem:[#allocation5 + $0x144] sm:$0xf] }
  0x88   :  { %v1885_v57 = vor.u32 %v2191_v53, %v1882_v55  ;;  %1114 = vmatpush.bf16.msrb.mxu3 %v1957_v63  ;;  %v2220_v63 = vld [vmem:[#allocation7 + $0x28] sm:$0xff] }
  0x89   :  { %1089 = vmatpush.bf16.msrb.mxu1 %v1805_v10 }
  0x8a   :  { %1101 = vmatpush.bf16.msrb.mxu2 %v1885_v57 }
  0x8b   :  { %1076 = vmatpush.bf16.msrb.mxu0 %v1733_v5 }
  0x8c   :  { %1115 = vmatpush.bf16.msrb.mxu3 %v1949_v12  ;;  %v2225_v12 = vld [vmem:[#allocation7 + $0x50] sm:$0xff] }
  0x8d   :  { %1090 = vmatpush.bf16.msrb.mxu1 %v1797_v27  ;;  %v1930_v27 = vld [vmem:[#allocation5 + $0x1a8] sm:$0xf0] }
  0x8e   :  { %1102 = vmatpush.bf16.msrb.mxu2 %v1877_v4  ;;  %v1933_v30 = vor.u32 %v2203_v24, %v1930_v27  ;;  %v2229_v4 = vld [vmem:[#allocation7 + $0x70] sm:$0xff] }
  0x8f   :  { %1077 = vmatpush.bf16.msrb.mxu0 %v1725_v18  ;;  %v2205_v18 = vld [vmem:[#allocation5 + $0x1b4] sm:$0xf] }
  0x90   :  { %v1941_v21 = vor.u32 %v2205_v18, %v1938_v19 }
  0x91   :  { %1091 = vmatpush.bf16.msrb.mxu1 %v1789_v38  ;;  %v1914_v38 = vld [vmem:[#allocation5 + $0x188] sm:$0xf0] }
  0x92   :  { %1103 = vmatpush.bf16.msrb.mxu2 %v1869_v17  ;;  %1116 = vmatpush.bf16.msrb.mxu3 %v1941_v21  ;;  %v1917_v39 = vor.u32 %v2199_v37, %v1914_v38  ;;  %v2223_v17 = vld [vmem:[#allocation7 + $0x40] sm:$0xff] }
  0x96   :  { %1117 = vmatpush.bf16.msrb.mxu3 %v1933_v30 }
  0xaf   :  { %v509_v26 = vpop.f32.mrf.mxu0 }
  0xb0   :  { %v510_v34 = vadd.f32 %v509_v26, %v159_v23 }
  0xb1   :  { %v523_v28 = vpop.f32.mrf.mxu1 }
  0xb2   :  { %v524_v44 = vadd.f32 %v523_v28, %v510_v34  ;;  %v2183_v28 = vld [vmem:[#allocation5 + $0x104] sm:$0xf]  ;;  %v1925_v34 = vor.u32 %v2201_v32, %v1922_v33 }
  0xb3   :  { %v1853_v31 = vor.u32 %v2183_v28, %v1850_v29 }
  0xb4   :  { %v612_v58 = vmax.f32 %v524_v44, 0.0  ;;  %1118 = vmatpush.bf16.msrb.mxu3 %v1925_v34 }
  0xb7   :  { %v537_v45 = vpop.f32.mrf.mxu2  ;;  %v511_v48 = vpop.f32.mrf.mxu0 }
  0xb8   :  { %v551_v49 = vpop.f32.mrf.mxu3  ;;  %v512_v51 = vadd.f32 %v511_v48, %v159_v23  ;;  %v538_v56 = vadd.f32 %v537_v45, %v160_v42  ;;  %v1858_v23 = vld [vmem:[#allocation5 + $0x118] sm:$0xf0]  ;;  %1119 = vmatpush.bf16.msrb.mxu3 %v1917_v39 }
  0xb9   :  { %v525_v52 = vpop.f32.mrf.mxu1  ;;  %v1861_v26 = vor.u32 %v2185_v22, %v1858_v23 }
  0xba   :  { %v526_v60 = vadd.f32 %v525_v52, %v512_v51  ;;  %v552_v3 = vadd.f32 %v551_v49, %v538_v56 }
  0xbb   :  { %1104 = vmatpush.bf16.msrb.mxu2 %v1861_v26 }
  0xbc   :  { %v616_v0 = vmax.f32 %v526_v60, 0.0  ;;  %v613_v15 = vmax.f32 %v552_v3, 0.0  ;;  %v2217_v3 = vld [vmem:[#allocation7 + $0x10] sm:$0xff] }
  0xbe   :  { %v620_v5 = vpack.c.bf16 %v616_v0, %v612_v58  ;;  %v2219_v0 = vld [vmem:[#allocation7 + $0x20] sm:$0xff] }
  0xbf   :  { %v539_v6 = vpop.f32.mrf.mxu2  ;;  %1105 = vmatpush.bf16.msrb.mxu2 %v1853_v31 }
  0xc0   :  { %v540_v10 = vadd.f32 %v539_v6, %v160_v42  ;;  %v553_v11 = vpop.f32.mrf.mxu3  ;;  %1022 = vmatmul.bf16.vlgmr.msra.gmra.mxu0 %v620_v5  ;;  %v2228_v6 = vld [vmem:[#allocation7 + $0x68] sm:$0xff] }
  0xc1   :  { %1264 = vmatpush.bf16.msra.mxu0 %v2222_v61  ;;  %v2231_v61 = vld [vmem:[%s2547_s7] sm:$0xff] }
  0xc2   :  { %v554_v16 = vadd.f32 %v553_v11, %v540_v10  ;;  %v2226_v10 = vld [vmem:[#allocation7 + $0x58] sm:$0xff] }
  0xc4   :  { %v617_v20 = vmax.f32 %v554_v16, 0.0 }
  0xc5   :  { %1265 = vmatpush.bf16.msra.mxu0 %v2221_v62  ;;  %v2242_v62 = vld [vmem:[%s2549_s9 + $0x18] sm:$0xff] }
  0xc6   :  { %v621_v25 = vpack.c.bf16 %v617_v20, %v613_v15  ;;  %v688_v15 = vld [vmem:[%s2544_s4] sm:$0x3] }
  0xc7   :  { %v690_v18 = vperm.slane %v688_v15, 0 }
  0xc8   :  { %1036 = vmatmul.bf16.vlgmr.msra.gmra.mxu1 %v621_v25 }
  0xc9   :  { %1266 = vmatpush.bf16.msra.mxu0 %v2220_v63  ;;  %1278 = vmatpush.bf16.msra.mxu1 %v2230_v2 }
  0xcd   :  { %1267 = vmatpush.bf16.msra.mxu0 %v2219_v0  ;;  %1279 = vmatpush.bf16.msra.mxu1 %v2229_v4 }
  0xcf   :  { %v565_v54 = vpop.f32.mrf.mxu0 }
  0xd0   :  { %1078 = vmatmul.bf16.vlgmr.msrb.gmra.mxu0 %v620_v5  ;;  %v566_v59 = vadd.f32 %v565_v54, %v161_v35  ;;  %v2216_v5 = vld [vmem:[#allocation7 + $0x8] sm:$0xff] }
  0xd1   :  { %v579_v36 = vpop.f32.mrf.mxu1  ;;  %1268 = vmatpush.bf16.msra.mxu0 %v2218_v1  ;;  %1280 = vmatpush.bf16.msra.mxu1 %v2228_v6  ;;  %v2258_v1 = vld [vmem:[%s2546_s6] ss:$0 sm:$0xff] }
  0xd2   :  { %v580_v44 = vadd.f32 %v579_v36, %v566_v59  ;;  %v691_v36 = vperm.slane %v688_v15, 1 }
  0xd4   :  { %v614_v49 = vmax.f32 %v580_v44, 0.0 }
  0xd5   :  { %1269 = vmatpush.bf16.msra.mxu0 %v2217_v3  ;;  %1281 = vmatpush.bf16.msra.mxu1 %v2227_v8 }
  0xd6   :  { %v593_v40 = vpop.f32.mrf.mxu2 }
  0xd7   :  { %v567_v43 = vpop.f32.mrf.mxu0  ;;  %v594_v48 = vadd.f32 %v593_v40, %v162_v41 }
  0xd8   :  { %v607_v42 = vpop.f32.mrf.mxu3  ;;  %v568_v45 = vadd.f32 %v567_v43, %v161_v35  ;;  %1092 = vmatmul.bf16.vlgmr.msrb.gmra.mxu1 %v621_v25 }
  0xd9   :  { %v581_v46 = vpop.f32.mrf.mxu1  ;;  %v608_v53 = vadd.f32 %v607_v42, %v594_v48  ;;  %1270 = vmatpush.bf16.msra.mxu0 %v2216_v5  ;;  %1282 = vmatpush.bf16.msra.mxu1 %v2226_v10 }
  0xda   :  { %v582_v47 = vadd.f32 %v581_v46, %v568_v45 }
  0xdb   :  { %v615_v58 = vmax.f32 %v608_v53, 0.0  ;;  %v2238_v53 = vld [vmem:[%s2547_s7 + $0x38] sm:$0xff] }
  0xdc   :  { %v618_v50 = vmax.f32 %v582_v47, 0.0 }
  0xdd   :  { %1271 = vmatpush.bf16.msra.mxu0 %v2215_v7  ;;  %1283 = vmatpush.bf16.msra.mxu1 %v2225_v12  ;;  %v2241_v12 = vld [vmem:[%s2549_s9 + $0x10] sm:$0xff] }
  0xde   :  { %v622_v51 = vpack.c.bf16 %v618_v50, %v614_v49  ;;  %v595_v52 = vpop.f32.mrf.mxu2 }
  0xdf   :  { %v596_v55 = vadd.f32 %v595_v52, %v162_v41 }
  0xe0   :  { %v609_v56 = vpop.f32.mrf.mxu3  ;;  %1050 = vmatmul.bf16.vlgmr.msra.gmra.mxu2 %v622_v51 }
  0xe1   :  { %v610_v57 = vadd.f32 %v609_v56, %v596_v55  ;;  %1284 = vmatpush.bf16.msra.mxu1 %v2224_v14  ;;  %1363 = vmatpush.bf16.msra.mxu2 %v2238_v53  ;;  %v2237_v55 = vld [vmem:[%s2547_s7 + $0x30] sm:$0xff]  ;;  %v2236_v56 = vld [vmem:[%s2547_s7 + $0x28] sm:$0xff]  ;;  %v2239_v14 = vld [vmem:[%s2549_s9] sm:$0xff] }
  0xe3   :  { %v619_v60 = vmax.f32 %v610_v57, 0.0  ;;  %v2235_v57 = vld [vmem:[%s2547_s7 + $0x20] sm:$0xff] }
  0xe5   :  { %v623_v9 = vpack.c.bf16 %v619_v60, %v615_v58  ;;  %1285 = vmatpush.bf16.msra.mxu1 %v2223_v17  ;;  %1364 = vmatpush.bf16.msra.mxu2 %v2237_v55  ;;  %v2234_v58 = vld [vmem:[%s2547_s7 + $0x18] sm:$0xff]  ;;  %v2233_v60 = vld [vmem:[%s2547_s7 + $0x10] sm:$0xff] }
  0xe7   :  { %1064 = vmatmul.bf16.vlgmr.msra.gmra.mxu3 %v623_v9 }
  0xe8   :  { %1424 = vmatpush.bf16.msra.mxu3 %v2242_v62 }
  0xe9   :  { %1365 = vmatpush.bf16.msra.mxu2 %v2236_v56 }
  0xec   :  { %1425 = vmatpush.bf16.msra.mxu3 %v2241_v12 }
  0xed   :  { %1366 = vmatpush.bf16.msra.mxu2 %v2235_v57 }
  0xf0   :  { %1106 = vmatmul.bf16.vlgmr.msrb.gmra.mxu2 %v622_v51 }
  0xf1   :  { %1367 = vmatpush.bf16.msra.mxu2 %v2234_v58 }
  0xf5   :  { %1368 = vmatpush.bf16.msra.mxu2 %v2233_v60 }
  0xf7   :  { %1120 = vmatmul.bf16.vlgmr.msrb.gmra.mxu3 %v623_v9  ;;  %v2232_v9 = vld [vmem:[%s2547_s7 + $0x8] sm:$0xff] }
  0xf9   :  { %1369 = vmatpush.bf16.msra.mxu2 %v2232_v9 }
  0xfd   :  { %1370 = vmatpush.bf16.msra.mxu2 %v2231_v61 }
 0x13d   :  { %v1023_v11 = vpop.f32.mrf.mxu0 }
 0x13e   :  { %v1024_v21 = vadd.f32 %v1023_v11, %v690_v18 }
 0x145   :  { %v1037_v13 = vpop.f32.mrf.mxu1  ;;  %v1025_v19 = vpop.f32.mrf.mxu0 }
 0x146   :  { %v1038_v24 = vadd.f32 %v1037_v13, %v1024_v21  ;;  %v1026_v25 = vadd.f32 %v1025_v19, %v690_v18  ;;  %v2240_v13 = vld [vmem:[%s2549_s9 + $0x8] sm:$0xff]  ;;  %s2372_s9 = smov [#allocation8]  }
 0x147   :  { %1426 = vmatpush.bf16.msra.mxu3 %v2240_v13  ;;  %s1442_s30 = sshll.u32 %s2372_s9, 4  ;;  %s1443_s30 = int_to_ptr.vmem [resolvable:$true] %s1442_s30 }
 0x14b   :  { %1427 = vmatpush.bf16.msra.mxu3 %v2239_v14 }
 0x14d   :  { %v1039_v20 = vpop.f32.mrf.mxu1  ;;  %v1079_v28 = vpop.f32.mrf.mxu0 }
 0x14e   :  { %v1040_v26 = vadd.f32 %v1039_v20, %v1026_v25  ;;  %v1080_v59 = vadd.f32 %v1079_v28, %v691_v36 }
 0x155   :  { %v1093_v31 = vpop.f32.mrf.mxu1  ;;  %v1081_v38 = vpop.f32.mrf.mxu0 }
 0x156   :  { %v1094_v41 = vadd.f32 %v1093_v31, %v1080_v59  ;;  %v1082_v42 = vadd.f32 %v1081_v38, %v691_v36 }
 0x15d   :  { %v1095_v40 = vpop.f32.mrf.mxu1 }
 0x15e   :  { %v1096_v44 = vadd.f32 %v1095_v40, %v1082_v42 }
 0x163   :  { %v1051_v16 = vpop.f32.mrf.mxu2 }
 0x164   :  { %v1052_v27 = vadd.f32 %v1051_v16, %v1038_v24  ;;  %v2259_v16 = vld [vmem:[%s2548_s8] ss:$0 sm:$0xff]  ;;  %s1444_s8 = sshll.u32 %s2551_s11, 4  ;;  %s1445_s8 = int_to_ptr.hbm [resolvable:$true] %s1444_s8 }
 0x165   :  { %v2260_v24 = vld [vmem:[%s2550_s10] ss:$0 sm:$0xff] }
 0x16a   :  { %v1065_v22 = vpop.f32.mrf.mxu3 }
 0x16b   :  { %v1053_v23 = vpop.f32.mrf.mxu2  ;;  %v1066_v29 = vadd.f32 %v1065_v22, %v1052_v27 }
 0x16c   :  { %v1054_v30 = vadd.f32 %v1053_v23, %v1040_v26 }
 0x16d   :  { %v1126_v54 = vmax.f32 %v1066_v29, 0.0 }
 0x172   :  { %v1067_v32 = vpop.f32.mrf.mxu3 }
 0x173   :  { %v1068_v33 = vadd.f32 %v1067_v32, %v1054_v30  ;;  %v1107_v34 = vpop.f32.mrf.mxu2 }
 0x174   :  { %v1108_v45 = vadd.f32 %v1107_v34, %v1094_v41 }
 0x175   :  { %v1128_v35 = vmax.f32 %v1068_v33, 0.0 }
 0x177   :  { %v1130_v37 = vpack.c.bf16 %v1128_v35, %v1126_v54 }
 0x179   :  { %1272 = vmatmul.bf16.vlgmr.msra.gmra.mxu0 %v1130_v37 }
 0x17a   :  { %v1121_v39 = vpop.f32.mrf.mxu3 }
 0x17b   :  { %v1109_v43 = vpop.f32.mrf.mxu2  ;;  %v1122_v46 = vadd.f32 %v1121_v39, %v1108_v45 }
 0x17c   :  { %v1110_v47 = vadd.f32 %v1109_v43, %v1096_v44 }
 0x17d   :  { %v1127_v50 = vmax.f32 %v1122_v46, 0.0 }
 0x182   :  { %v1123_v48 = vpop.f32.mrf.mxu3 }
 0x183   :  { %v1124_v49 = vadd.f32 %v1123_v48, %v1110_v47 }
 0x185   :  { %v1129_v51 = vmax.f32 %v1124_v49, 0.0 }
 0x187   :  { %v1131_v52 = vpack.c.bf16 %v1129_v51, %v1127_v50 }
 0x189   :  { %1286 = vmatmul.bf16.vlgmr.msra.gmra.mxu1 %v1131_v52 }
 0x1f6   :  { %v1273_v63 = vpop.f32.mrf.mxu0 }
 0x1f7   :  { %v1274_v3 = vadd.f32 %v2258_v1, %v1273_v63 }
 0x1fe   :  { %v1275_v2 = vpop.f32.mrf.mxu0 }
 0x1ff   :  { %v1276_v4 = vadd.f32 %v2258_v1, %v1275_v2 }
 0x206   :  { %v1287_v0 = vpop.f32.mrf.mxu1 }
 0x207   :  { %v1288_v5 = vadd.f32 %v1287_v0, %v1274_v3 }
 0x209   :  { %v1292_v8 = vmax.f32 %v1288_v5, 0.0 }
 0x20e   :  { %v1289_v6 = vpop.f32.mrf.mxu1 }
 0x20f   :  { %v1290_v7 = vadd.f32 %v1289_v6, %v1276_v4 }
 0x211   :  { %v1293_v10 = vmax.f32 %v1290_v7, 0.0 }
 0x213   :  { %v1294_v11 = vpack.c.bf16 %v1293_v10, %v1292_v8 }
 0x215   :  { %1371 = vmatmul.bf16.vlgmr.msra.gmra.mxu2 %v1294_v11 }
 0x298   :  { %v1372_v15 = vpop.f32.mrf.mxu2 }
 0x299   :  { %v1373_v17 = vadd.f32 %v2259_v16, %v1372_v15 }
 0x29b   :  { %v1377_v20 = vmax.f32 %v1373_v17, 0.0 }
 0x2a0   :  { %v1374_v18 = vpop.f32.mrf.mxu2 }
 0x2a1   :  { %v1375_v19 = vadd.f32 %v2259_v16, %v1374_v18 }
 0x2a3   :  { %v1378_v21 = vmax.f32 %v1375_v19, 0.0 }
 0x2a5   :  { %v1379_v22 = vpack.c.bf16 %v1378_v21, %v1377_v20 }
 0x2a7   :  { %2086 = vmatmul.msk.bf16.vlgmr.msra.gmra.mxu3 %vm1416_vm2, %v1379_v22 }
 0x32a   :  { %v1429_v23 = vpop.f32.mrf.mxu3 }
 0x32b   :  { %v1430_v26 = vadd.f32 %v2260_v24, %v1429_v23 }
 0x332   :  { %v1431_v25 = vpop.f32.mrf.mxu3 }
 0x333   :  { %v1432_v27 = vadd.f32 %v2260_v24, %v1431_v25 }
 0x335   :  { %v2246_v28 = vpack.c.bf16 %v1432_v27, %v1430_v26 }
 0x337   :  { %2247 = vst [vmem:[#allocation8] sm:$0xff] %v2246_v28  }
 0x338   :  { %1450 = dma.vmem_to_hbm [thread:$0]  %s1443_s30, 128, %s1445_s8, [#allocation4], %s2370_s16, %s2370_s16, %s2371_s1  }
 0x339   :  { %2361 = dma.done.wait [#allocation4], 128  }
 0x33a   :  { %2362 = vsyncadd [#allocation4], 4294967168 }
 0x33b   :  { %1455 = vsyncpa [#allocation3], 1 }
 0x33c   :  { %1456 = vsyncpa [#allocation6], 1 }
 0x33d   :  { %1457 = vsyncpa [#allocation4], 1 }

</bundles_post_ra>
